<compile_context>
chip_gen: v6e
topology: v6e:2x2x1
jax: 0.10.0
libtpu: 0.0.40
codegen_flags: <defaults>
</compile_context>

<pallas_src>
import functools

import jax
import jax.numpy as jnp
from jax.experimental import pallas as pl
from jax.experimental.pallas import tpu as pltpu


_VMEM_LIMIT_BYTES = 32 * 1024 * 1024      # ample for our blocks; safe on v5e/v6e/v7x
_TARGET_BLOCK_BYTES = 2 * 1024 * 1024     # ~2 MiB f32 input block per grid step
_MAX_PACKED_LANES = 512                   # pack lanes up to a 4x multiple of 128


# ----------------------------------------------------------------------------
# Tiling helpers
# ----------------------------------------------------------------------------
def _pack_factor(D, R):
    """Rows folded into the lane dim for lane-dense loads/stores (free reshape)."""
    if D >= 128 or (128 % D) != 0:
        return 1
    gp = 128 // D
    if R % gp != 0:
        return 1
    while gp * 2 * D <= _MAX_PACKED_LANES and R % (gp * 2) == 0:
        gp *= 2
    return gp


def _choose_row_tile(Rp, Dp):
    """Row-tile size: multiple of 8 (or full extent), ~_TARGET_BLOCK_BYTES f32."""
    if Rp <= 8:
        return Rp
    tr = max(8, min(Rp, _TARGET_BLOCK_BYTES // (Dp * 4)))
    tr = max(8, (tr // 8) * 8)
    return min(tr, 2048)


# ----------------------------------------------------------------------------
# Kernels
# ----------------------------------------------------------------------------
def _stats_kernel(x_ref, stats_ref, *, n_rows, tile_rows):
    """Pass 1: accumulate per-feature sum and sum-of-squares over row tiles."""
    r = pl.program_id(1)
    x = x_ref[0].astype(jnp.float32)                          # (TR, Dp)
    if n_rows % tile_rows != 0:
        # Mask padded rows of the last (partial) tile.
        row = jax.lax.broadcasted_iota(jnp.int32, (tile_rows, 1), 0) + r * tile_rows
        x = jnp.where(row < n_rows, x, 0.0)
    s = jnp.sum(x, axis=0, keepdims=True)                     # (1, Dp)
    sq = jnp.sum(x * x, axis=0, keepdims=True)                # (1, Dp)
    part = jnp.concatenate([s, sq], axis=0)[None]             # (1, 2, Dp)

    @pl.when(r == 0)
    def _():
        stats_ref[...] = part

    @pl.when(r != 0)
    def _():
        stats_ref[...] += part


def _apply_kernel(x_ref, scale_ref, shift_ref, o_ref):
    """Pass 2: y = x * scale + shift (scale/shift precomputed per group/feature)."""
    x = x_ref[...].astype(jnp.float32)                        # (1, TR, Dp)
    o_ref[...] = (x * scale_ref[...] + shift_ref[...]).astype(o_ref.dtype)


# ----------------------------------------------------------------------------
# Grouped normalization (shared by batch / instance paths)
# ----------------------------------------------------------------------------
def _grouped_norm(xg, gamma, beta, eps):
    """Normalize each of G independent groups of R rows, per feature d.

    xg: (G, R, D) — reduction over the R axis within each group.
    gamma/beta: (D,) affine parameters applied per feature.
    """
    G, R, D = xg.shape
    gp = _pack_factor(D, R)
    Dp, Rp = gp * D, R // gp
    xp = xg.reshape(G, Rp, Dp)                 # free reshape (row-major contiguous)
    TR = _choose_row_tile(Rp, Dp)
    ntiles = pl.cdiv(Rp, TR)
    itemsize = jnp.dtype(xg.dtype).itemsize

    # ---- pass 1: streaming per-(group, packed-feature) sum / sum-of-squares ----
    stats = pl.pallas_call(
        functools.partial(_stats_kernel, n_rows=Rp, tile_rows=TR),
        out_shape=jax.ShapeDtypeStruct((G, 2, Dp), jnp.float32),
        grid=(G, ntiles),
        in_specs=[pl.BlockSpec((1, TR, Dp), lambda g, r: (g, r, 0))],
        out_specs=pl.BlockSpec((1, 2, Dp), lambda g, r: (g, 0, 0)),
        compiler_params=pltpu.CompilerParams(
            dimension_semantics=("parallel", "arbitrary"),
            vmem_limit_bytes=_VMEM_LIMIT_BYTES,
        ),
        cost_estimate=pl.CostEstimate(
            flops=3 * G * Rp * Dp,
            transcendentals=0,
            bytes_accessed=G * Rp * Dp * itemsize + G * 2 * Dp * 4,
        ),
    )(xp)

    # ---- tiny O(G*D) finalize in plain JAX: fold packed lanes, build affine ----
    sums = stats[:, 0, :].reshape(G, gp, D).sum(axis=1)       # (G, D)
    sqs = stats[:, 1, :].reshape(G, gp, D).sum(axis=1)        # (G, D)
    mean = sums / R
    var = jnp.maximum(sqs / R - mean * mean, 0.0)             # biased variance
    inv_std = jax.lax.rsqrt(var + eps)
    scale = gamma[None, :].astype(jnp.float32) * inv_std      # (G, D)
    shift = beta[None, :].astype(jnp.float32) - mean * scale  # (G, D)
    scale_p = jnp.tile(scale, (1, gp)).reshape(G, 1, Dp)      # packed layout
    shift_p = jnp.tile(shift, (1, gp)).reshape(G, 1, Dp)

    # ---- pass 2: stream x again, fused multiply-add, lane-dense stores ----
    yp = pl.pallas_call(
        _apply_kernel,
        out_shape=jax.ShapeDtypeStruct((G, Rp, Dp), xg.dtype),
        grid=(G, ntiles),
        in_specs=[
            pl.BlockSpec((1, TR, Dp), lambda g, r: (g, r, 0)),
            pl.BlockSpec((1, 1, Dp), lambda g, r: (g, 0, 0)),   # loaded once per g
            pl.BlockSpec((1, 1, Dp), lambda g, r: (g, 0, 0)),
        ],
        out_specs=pl.BlockSpec((1, TR, Dp), lambda g, r: (g, r, 0)),
        compiler_params=pltpu.CompilerParams(
            dimension_semantics=("parallel", "parallel"),
            vmem_limit_bytes=_VMEM_LIMIT_BYTES,
        ),
        cost_estimate=pl.CostEstimate(
            flops=2 * G * Rp * Dp,
            transcendentals=0,
            bytes_accessed=2 * G * Rp * Dp * itemsize + 2 * G * Dp * 4,
        ),
    )(xp, scale_p, shift_p)

    return yp.reshape(G, R, D)


# ----------------------------------------------------------------------------
# Module-equivalent wrapper
# ----------------------------------------------------------------------------
def normalization_forward(x, gamma, beta, *, normalization="batch", eps=1e-5):
    """Equivalent of Normalization(embed_dim, normalization).forward(x).

    x:     (B, S, D) array (embed_dim last); gamma/beta: (D,)
    """
    if normalization == "batch":
        D = x.shape[-1]
        xg = x.reshape(1, -1, D)                  # one group over all B*S rows
        return _grouped_norm(xg, gamma, beta, eps).reshape(x.shape)
    elif normalization == "instance":
        assert x.ndim == 3, "instance norm expects (B, S, D)"
        return _grouped_norm(x, gamma, beta, eps)  # per-(b, d) stats over S
    else:
        # Unknown normalizer -> identity (matches `self.normalizer is None`)
        return x


# ----------------------------------------------------------------------------
# Pure-JAX references (verification only)
# ----------------------------------------------------------------------------
def _ref_batch(x, gamma, beta, eps=1e-5):
    B, S, D = x.shape
    xf = x.reshape(-1, D).astype(jnp.float32)
    mean = xf.mean(axis=0, keepdims=True)
    var = ((xf - mean) ** 2).mean(axis=0, keepdims=True)
    y = (xf - mean) / jnp.sqrt(var + eps) * gamma + beta
    return y.reshape(B, S, D).astype(x.dtype)


def _ref_instance(x, gamma, beta, eps=1e-5):
    xf = x.astype(jnp.float32)
    mean = xf.mean(axis=1, keepdims=True)
    var = ((xf - mean) ** 2).mean(axis=1, keepdims=True)
    y = (xf - mean) / jnp.sqrt(var + eps) * gamma.reshape(1, 1, -1) + beta.reshape(1, 1, -1)
    return y.astype(x.dtype)


if __name__ == "__main__":
    # Small shapes consistent with the module: (batch, seq, embed_dim)
    B, S, D = 2, 8, 32
    key = jax.random.PRNGKey(0)
    kx, kg, kb = jax.random.split(key, 3)

    x = jax.random.normal(kx, (B, S, D), dtype=jnp.float32)
    gamma = 1.0 + jax.random.uniform(kg, (D,), minval=-0.2, maxval=0.2, dtype=jnp.float32)
    beta = jax.random.uniform(kb, (D,), minval=-0.2, maxval=0.2, dtype=jnp.float32)

    y_batch = jax.block_until_ready(
        normalization_forward(x, gamma, beta, normalization="batch"))
    assert jnp.allclose(y_batch, _ref_batch(x, gamma, beta), atol=1e-4, rtol=1e-4)

    y_inst = jax.block_until_ready(
        normalization_forward(x, gamma, beta, normalization="instance"))
    assert jnp.allclose(y_inst, _ref_instance(x, gamma, beta), atol=1e-4, rtol=1e-4)

    # Second shape with D >= 128 and a sequence length that does not divide the
    # row tile: exercises the no-packing path, partial tiles and row masking.
    B2, S2, D2 = 4, 50, 128
    x2 = jax.random.normal(kx, (B2, S2, D2), dtype=jnp.float32)
    g2 = 1.0 + jax.random.uniform(kg, (D2,), minval=-0.2, maxval=0.2, dtype=jnp.float32)
    b2 = jax.random.uniform(kb, (D2,), minval=-0.2, maxval=0.2, dtype=jnp.float32)

    y2b = jax.block_until_ready(
        normalization_forward(x2, g2, b2, normalization="batch"))
    assert jnp.allclose(y2b, _ref_batch(x2, g2, b2), atol=1e-4, rtol=1e-4)

    y2i = jax.block_until_ready(
        normalization_forward(x2, g2, b2, normalization="instance"))
    assert jnp.allclose(y2i, _ref_instance(x2, g2, b2), atol=1e-4, rtol=1e-4)

    print("KERNEL_OK")
</pallas_src>

<mosaic_0001>
module attributes {stable_mosaic.version = 11 : i64} {
  func.func @_stats_kernel(%arg0: i32, %arg1: i32, %arg2: memref<1x1x512xf32, #tpu.memory_space<vmem>>, %arg3: memref<1x2x512xf32, #tpu.memory_space<vmem>>) attributes {dimension_semantics = [#tpu.dimension_semantics<parallel>, #tpu.dimension_semantics<arbitrary>], iteration_bounds = array<i64: 1, 1>, scalar_prefetch = 0 : i64, scratch_operands = 0 : i64, tpu.core_type = #tpu.core_type<tc>, window_params = [{transform_indices = @transform_0, window_bounds = array<i64: 1, 1, 512>}, {transform_indices = @transform_1, window_bounds = array<i64: 1, 2, 512>}]} {
    %c0 = arith.constant 0 : index
    %c0_0 = arith.constant 0 : index
    %c0_1 = arith.constant 0 : index
    %0 = vector.load %arg2[%c0, %c0_0, %c0_1] : memref<1x1x512xf32, #tpu.memory_space<vmem>>, vector<1x1x512xf32>
    %1 = vector.shape_cast %0 : vector<1x1x512xf32> to vector<1x512xf32>
    %cst = arith.constant dense<0.000000e+00> : vector<512xf32>
    %2 = vector.multi_reduction <add>, %1, %cst [0] : vector<1x512xf32> to vector<512xf32>
    %3 = vector.shape_cast %2 : vector<512xf32> to vector<1x512xf32>
    %4 = arith.mulf %1, %1 : vector<1x512xf32>
    %cst_2 = arith.constant dense<0.000000e+00> : vector<512xf32>
    %5 = vector.multi_reduction <add>, %4, %cst_2 [0] : vector<1x512xf32> to vector<512xf32>
    %6 = vector.shape_cast %5 : vector<512xf32> to vector<1x512xf32>
    %7 = tpu.concatenate %3, %6 in 0 : vector<1x512xf32>, vector<1x512xf32> -> vector<2x512xf32>
    %8 = vector.shape_cast %7 : vector<2x512xf32> to vector<1x2x512xf32>
    %c0_i32 = arith.constant 0 : i32
    %9 = arith.cmpi eq, %arg1, %c0_i32 : i32
    %10 = arith.extui %9 : i1 to i32
    %c0_i32_3 = arith.constant 0 : i32
    %11 = arith.cmpi ne, %10, %c0_i32_3 : i32
    scf.if %11 {
      %c0_6 = arith.constant 0 : index
      %c0_7 = arith.constant 0 : index
      %c0_8 = arith.constant 0 : index
      %15 = vector.load %arg3[%c0_6, %c0_7, %c0_8] : memref<1x2x512xf32, #tpu.memory_space<vmem>>, vector<1x2x512xf32>
      tpu.vector_store %arg3[%c0_6, %c0_7, %c0_8], %8 {strides = array<i32>} : memref<1x2x512xf32, #tpu.memory_space<vmem>>, vector<1x2x512xf32>,
    } else {
    }
    %c0_i32_4 = arith.constant 0 : i32
    %12 = arith.cmpi ne, %arg1, %c0_i32_4 : i32
    %13 = arith.extui %12 : i1 to i32
    %c0_i32_5 = arith.constant 0 : i32
    %14 = arith.cmpi ne, %13, %c0_i32_5 : i32
    scf.if %14 {
      %c0_6 = arith.constant 0 : index
      %c0_7 = arith.constant 0 : index
      %c0_8 = arith.constant 0 : index
      %15 = vector.load %arg3[%c0_6, %c0_7, %c0_8] : memref<1x2x512xf32, #tpu.memory_space<vmem>>, vector<1x2x512xf32>
      %16 = arith.addf %15, %8 : vector<1x2x512xf32>
      %c0_9 = arith.constant 0 : index
      %c0_10 = arith.constant 0 : index
      %c0_11 = arith.constant 0 : index
      %17 = vector.load %arg3[%c0_9, %c0_10, %c0_11] : memref<1x2x512xf32, #tpu.memory_space<vmem>>, vector<1x2x512xf32>
      tpu.vector_store %arg3[%c0_9, %c0_10, %c0_11], %16 {strides = array<i32>} : memref<1x2x512xf32, #tpu.memory_space<vmem>>, vector<1x2x512xf32>,
    } else {
    }
    return
  }
  func.func @transform_0(%arg0: i32, %arg1: i32) -> (i32, i32, i32) {
    %c0_i32 = arith.constant 0 : i32
    %c0_i32_0 = arith.constant 0 : i32
    return %arg0, %arg1, %c0_i32 : i32, i32, i32
  }
  func.func @transform_1(%arg0: i32, %arg1: i32) -> (i32, i32, i32) {
    %c0_i32 = arith.constant 0 : i32
    %c0_i32_0 = arith.constant 0 : i32
    %c0_i32_1 = arith.constant 0 : i32
    return %arg0, %c0_i32, %c0_i32_0 : i32, i32, i32
  }
}

</mosaic_0001>

<bundles_post_ra>
// kernel: tpu_custom_call.1
= control target key start
LH: loop header
LB: loop body
LE: loop exit
PB: predicated region body
PF: predicated region fallthrough
CT: control target
= control target key end

     0   :  { %6 = vsyncpa [#allocation3], 0  ;;  %s209_s0 = inlined_call_operand.hbm [shape: f32[1,1,512], index: 0, kind: input, shape index: {}]   ;;  %s210_s1 = inlined_call_operand.hbm [shape: f32[1,2,512], index: 1, kind: output, shape index: {}]  }
   0x1   :  { %7 = vsyncpa [#allocation4], 0  ;;  %s190_s6 = smov [#allocation2]  }
   0x2   :  { %s14_s7 = sshll.u32 %s190_s6, 4  ;;  %s15_s7 = int_to_ptr.vmem [resolvable:$true] %s14_s7 }
   0x3   :  { %s154_s8 = scalar_lea.vmem %s15_s7, 64  ;;  %p159_p1 = scmp.lt.s32.totalorder %s15_s7, %s15_s7 }
   0x4   :  { %p155_p0 = scmp.ne.s32.totalorder %s15_s7, %s154_s8  ;;  %p160_p2 = scmp.lt.s32.totalorder %s154_s8, %s154_s8 }
   0x6   :  { %p161_p3 = por %p160_p2, %p159_p1 }
   0x8   :  { %p162_p4 = pnand %p161_p3, %p155_p0 }
   0xa   :  { %165 = shalt.err (!%p162_p4)
}
   0xb   :  { %17 = dma.hbm_to_vmem [thread:$0]  %s209_s0, 64, %s15_s7, [#allocation3]  }
   0xc   :  { %186 = dma.done.wait [#allocation3], 64  }
   0xd   :  { %187 = vsyncadd [#allocation3], 4294967232  ;;  %v26_v0 = vlaneseq  ;;  %v191_v2 = vmov 1983009808   ;;  %v21_v8 = vld [vmem:[#allocation2] sm:$0xf] }
   0xe   :  { %v83_v3 = vunpack.c.l.s4 %v191_v2  ;;  %v23_v10 = vmul.f32 %v21_v8, %v21_v8  ;;  %vm67_vm0 = vcmask 1040384   ;;  %s192_s0 = smov [#allocation5]  }
   0xf   :  { %v27_v1 = vshrl.u32 %v26_v0, 7  ;;  %s134_s11 = sshll.u32 %s192_s0, 4  ;;  %s135_s11 = int_to_ptr.vmem [resolvable:$true] %s134_s11 }
  0x10   :  { %v84_v9 = vunpack.c.0.s8 %v83_v3  ;;  %s166_s12 = scalar_lea.vmem %s135_s11, 128  ;;  %p171_p6 = scmp.lt.s32.totalorder %s135_s11, %s135_s11 }
  0x11   :  { %v28_v4 = vsub.s32 0, %v27_v1  ;;  %v32_v5 = vsub.s32 1, %v27_v1  ;;  %v36_v6 = vsub.s32 2, %v27_v1  ;;  %v40_v7 = vsub.s32 3, %v27_v1  ;;  %p167_p5 = scmp.ne.s32.totalorder %s135_s11, %s166_s12  ;;  %p172_p7 = scmp.lt.s32.totalorder %s166_s12, %s166_s12 }
  0x12   :  { %v87_v19 = vsub.s32 %v84_v9, %v27_v1 }
  0x13   :  { %v29_v11 = vrot.slane %v21_v8, %v28_v4  ;;  %v33_v12 = vrot.slane %v21_v8, %v32_v5  ;;  %v37_v13 = vrot.slane %v21_v8, %v36_v6  ;;  %v41_v14 = vrot.slane %v21_v8, %v40_v7  ;;  %p173_p8 = por %p172_p7, %p171_p6 }
  0x14   :  { %v50_v15 = vrot.slane %v23_v10, %v28_v4  ;;  %v54_v16 = vrot.slane %v23_v10, %v32_v5  ;;  %v58_v17 = vrot.slane %v23_v10, %v36_v6  ;;  %v62_v18 = vrot.slane %v23_v10, %v40_v7 }
  0x15   :  { %p174_p9 = pnand %p173_p8, %p167_p5 }
  0x16   :  { %v68_v20 = vsel %vm67_vm0, %v29_v11, %v50_v15  ;;  %v69_v21 = vsel %vm67_vm0, %v33_v12, %v54_v16  ;;  %v70_v22 = vsel %vm67_vm0, %v37_v13, %v58_v17  ;;  %v71_v23 = vsel %vm67_vm0, %v41_v14, %v62_v18 }
  0x17   :  { %v80_v24 = vcombine.low %v68_v20, %v69_v21  ;;  %v81_v25 = vcombine.low %v70_v22, %v71_v23 }
  0x19   :  { %v88_v26 = vrot.slane %v80_v24, %v87_v19  ;;  %v95_v27 = vrot.slane %v81_v25, %v87_v19 }
  0x1b   :  { %v96_v28 = vcombine.low %v88_v26, %v95_v27 }
  0x1d   :  { %98 = vst [vmem:[#allocation5] sm:$0xff] %v96_v28 }
  0x1e   :  { %177 = shalt.err (!%p174_p9)
}
  0x1f   :  { %137 = dma.vmem_to_hbm [thread:$0]  %s135_s11, 128, %s210_s1, [#allocation4]  }
  0x20   :  { %188 = dma.done.wait [#allocation4], 128  }
  0x21   :  { %189 = vsyncadd [#allocation4], 4294967168 }
  0x22   :  { %141 = vsyncpa [#allocation3], 1 }
  0x23   :  { %142 = vsyncpa [#allocation4], 1 }

</bundles_post_ra>
